<compile_context>
chip_gen: v6e
topology: v6e:2x2x1
jax: 0.10.0
libtpu: 0.0.40
codegen_flags: <defaults>
</compile_context>

<pallas_src>
import jax
import jax.numpy as jnp
from jax.experimental import pallas as pl
from jax.experimental.pallas import tpu as pltpu


def _round_up(x: int, m: int) -> int:
    return (x + m - 1) // m * m


def _vmem_capacity_bytes() -> int:
    """Physical VMEM per TensorCore; conservative 64 MiB (v7x) if the query fails."""
    try:
        cap = int(getattr(pltpu.get_tpu_info(), "vmem_capacity_bytes"))
        if cap > 0:
            return cap
    except Exception:
        pass
    return 64 << 20


# --------------------------------------------------------------------------- kernels
def mlp_kernel_resident(x_ref, w1_ref, b1_ref, w2_ref, b2_ref, o_ref):
    """Whole network for one batch tile; w1/w2/biases VMEM-resident (no K loop)."""
    x = x_ref[...].astype(jnp.bfloat16)                       # per-tile cast (f32 or bf16 in)
    h = jnp.dot(x, w1_ref[...], preferred_element_type=jnp.float32) + b1_ref[...]
    h = jnp.maximum(h, 0.0).astype(w2_ref.dtype)              # ReLU, back to bf16
    logits = jnp.dot(h, w2_ref[...], preferred_element_type=jnp.float32)
    o_ref[...] = (logits + b2_ref[...]).astype(o_ref.dtype)


def mlp_kernel_ktiled(x_ref, w1_ref, b1_ref, w2_ref, b2_ref, o_ref, acc_ref):
    """One (TM, TK) batch/K tile of: ReLU(x @ w1 + b1) @ w2 + b2 (K-reduced in scratch)."""
    k = pl.program_id(1)
    x = x_ref[...].astype(jnp.bfloat16)
    part = jnp.dot(x, w1_ref[...], preferred_element_type=jnp.float32)

    @pl.when(k == 0)
    def _init():
        # Fused init: bias + first partial product in one write (no broadcast-then-RMW).
        acc_ref[...] = part + b1_ref[...]

    @pl.when(k > 0)
    def _accumulate():
        acc_ref[...] += part

    @pl.when(k == pl.num_programs(1) - 1)
    def _finalize():
        h = jnp.maximum(acc_ref[...], 0.0).astype(w2_ref.dtype)
        logits = jnp.dot(h, w2_ref[...], preferred_element_type=jnp.float32)
        o_ref[...] = (logits + b2_ref[...]).astype(o_ref.dtype)


# --------------------------------------------------------------------------- wrapper
def mlp_classifier_forward(x_nchw, w1, b1, w2, b2, *, tm_max=256, tk_max=None):
    """x_nchw: (b, 3, H, W) f32. w1: (D, Hd), b1: (Hd,), w2: (Hd, C), b2: (C,).

    Returns (b, num_classes) f32 logits, matching torch's x.view(b, -1) -> Linear ->
    ReLU -> Linear (bf16 MXU operands, f32 accumulation).
    """
    b = x_nchw.shape[0]
    x_flat = x_nchw.reshape(b, -1).astype(jnp.float32)        # same as torch .view(b, -1)
    d = x_flat.shape[1]
    hdim = w1.shape[1]
    c = w2.shape[1]

    h_pad = _round_up(hdim, 128)
    c_pad = _round_up(c, 128)                                  # lane-dense output store
    d_pad = _round_up(d, 128)

    # ---- per-generation VMEM budget ----------------------------------------------
    cap = _vmem_capacity_bytes()                               # 64 MiB (v7x) / 128 MiB (v5e/v6e)
    vmem_ceiling = min(cap - (16 << 20), 112 << 20)            # 48 MiB on v7x, 112 MiB else
    tile_budget = vmem_ceiling - (4 << 20)

    # ---- batch tile: multiple of 16, >=2 tiles when possible (v7x dual-TC) --------
    b_pad = _round_up(b, 16)
    if b_pad <= tm_max:
        tm = _round_up(-(-b_pad // 2), 16) if b_pad >= 32 else b_pad
    else:
        tm = tm_max
    b_pad = _round_up(b_pad, tm)

    xb_guess = 2 if (b_pad != b or d_pad != d) else 4          # bf16 if a wrapper pad is needed

    def _footprint(tm_, tk_, xb_, with_acc):
        fp = (2 * tm_ * tk_ * xb_                  # x tiles (double-buffered)
              + 2 * tk_ * h_pad * 2                # w1 tiles (bf16)
              + 2 * h_pad * 4 + 2 * c_pad * 4      # biases (f32)
              + 2 * h_pad * c_pad * 2              # w2 (bf16, resident)
              + 2 * tm_ * c_pad * 4)               # output tiles (f32)
        if with_acc:
            fp += tm_ * h_pad * 4                  # f32 accumulator scratch
        return fp

    def _max_tk(tm_, xb_):
        const = (2 * h_pad * 4 + 2 * c_pad * 4 + 2 * h_pad * c_pad * 2
                 + 2 * tm_ * c_pad * 4 + tm_ * h_pad * 4)
        per_tk = 2 * tm_ * xb_ + 4 * h_pad
        avail = tile_budget - const
        if avail <= per_tk * 128:
            return 128
        return max(128, (avail // per_tk) // 128 * 128)

    # ---- residency decision for w1 -------------------------------------------------
    resident = ((tk_max is None or d_pad <= tk_max)
                and _footprint(tm, d_pad, xb_guess, with_acc=False) <= tile_budget)

    if resident:
        tk = d_pad
        d_final = d_pad
    else:
        # Larger batch tiles re-read w1 fewer times in the HBM-bound regime.
        for tm_try in (1024, 512):
            if tm < tm_try and _round_up(b, 16) >= 2 * tm_try and _max_tk(tm_try, xb_guess) >= 512:
                tm = tm_try
                b_pad = _round_up(b, tm)
                break
        tk = _max_tk(tm, xb_guess)
        if tk_max is not None:
            tk = min(tk, max(128, _round_up(tk_max, 128)))
        tk = min(tk, d_pad)
        d_final = _round_up(d_pad, tk)

    needs_x_pad = (b_pad != b) or (d_final != d)

    # ---- operand prep ---------------------------------------------------------------
    if needs_x_pad:
        # Pad and bf16-cast share one wrapper pass.
        xp = jnp.pad(x_flat, ((0, b_pad - b), (0, d_final - d))).astype(jnp.bfloat16)
    else:
        # No wrapper pass: feed f32 straight from HBM, cast per tile inside the kernel.
        xp = x_flat
    w1p = jnp.pad(w1, ((0, d_final - d), (0, h_pad - hdim))).astype(jnp.bfloat16)
    b1p = jnp.pad(b1.reshape(1, -1), ((0, 0), (0, h_pad - hdim))).astype(jnp.float32)
    w2p = jnp.pad(w2, ((0, h_pad - hdim), (0, c_pad - c))).astype(jnp.bfloat16)
    b2p = jnp.pad(b2.reshape(1, -1), ((0, 0), (0, c_pad - c))).astype(jnp.float32)

    x_itemsize = 2 if needs_x_pad else 4
    n_btiles = b_pad // tm

    fp = _footprint(tm, tk, x_itemsize, with_acc=not resident)
    vmem_limit = int(min(vmem_ceiling, max(fp + (4 << 20), 32 << 20)))

    cost = pl.CostEstimate(
        flops=2 * b_pad * d_final * h_pad + 2 * b_pad * h_pad * c_pad,
        transcendentals=0,
        bytes_accessed=(b_pad * d_final * x_itemsize
                        + (1 if resident else n_btiles) * d_final * h_pad * 2
                        + h_pad * c_pad * 2 + (h_pad + c_pad) * 4
                        + b_pad * c_pad * 4),
    )

    if resident:
        grid_spec = pltpu.PrefetchScalarGridSpec(
            num_scalar_prefetch=0,
            grid=(n_btiles,),
            in_specs=[
                pl.BlockSpec((tm, d_final), lambda i: (i, 0)),      # x: batch tiled
                pl.BlockSpec((d_final, h_pad), lambda i: (0, 0)),   # w1: resident
                pl.BlockSpec((1, h_pad), lambda i: (0, 0)),         # b1: resident
                pl.BlockSpec((h_pad, c_pad), lambda i: (0, 0)),     # w2: resident
                pl.BlockSpec((1, c_pad), lambda i: (0, 0)),         # b2: resident
            ],
            out_specs=pl.BlockSpec((tm, c_pad), lambda i: (i, 0)),
            scratch_shapes=[],
        )
        kernel = mlp_kernel_resident
        dim_sem = ("parallel",)
    else:
        grid_spec = pltpu.PrefetchScalarGridSpec(
            num_scalar_prefetch=0,
            grid=(n_btiles, d_final // tk),
            in_specs=[
                pl.BlockSpec((tm, tk), lambda i, k: (i, k)),        # x: batch & K tiled
                pl.BlockSpec((tk, h_pad), lambda i, k: (k, 0)),     # w1: K tiled
                pl.BlockSpec((1, h_pad), lambda i, k: (0, 0)),      # b1: resident
                pl.BlockSpec((h_pad, c_pad), lambda i, k: (0, 0)),  # w2: resident
                pl.BlockSpec((1, c_pad), lambda i, k: (0, 0)),      # b2: resident
            ],
            out_specs=pl.BlockSpec((tm, c_pad), lambda i, k: (i, 0)),
            scratch_shapes=[pltpu.VMEM((tm, h_pad), jnp.float32)],
        )
        kernel = mlp_kernel_ktiled
        dim_sem = ("parallel", "arbitrary")

    out = pl.pallas_call(
        kernel,
        out_shape=jax.ShapeDtypeStruct((b_pad, c_pad), jnp.float32),
        grid_spec=grid_spec,
        compiler_params=pltpu.CompilerParams(
            dimension_semantics=dim_sem,
            vmem_limit_bytes=vmem_limit,
        ),
        cost_estimate=cost,
    )(xp, w1p, b1p, w2p, b2p)

    return out[:b, :c]


def init_params(key, input_dim, hidden_dim, num_classes):
    """Deterministic init matching nn.Linear's U(-1/sqrt(fan_in), 1/sqrt(fan_in)).
    Weights stored as (in, out) — transposed view of torch's (out, in), same math."""
    k1, k2, k3, k4 = jax.random.split(key, 4)
    lim1 = 1.0 / jnp.sqrt(jnp.float32(input_dim))
    lim2 = 1.0 / jnp.sqrt(jnp.float32(hidden_dim))
    w1 = jax.random.uniform(k1, (input_dim, hidden_dim), jnp.float32, -lim1, lim1)
    b1 = jax.random.uniform(k2, (hidden_dim,), jnp.float32, -lim1, lim1)
    w2 = jax.random.uniform(k3, (hidden_dim, num_classes), jnp.float32, -lim2, lim2)
    b2 = jax.random.uniform(k4, (num_classes,), jnp.float32, -lim2, lim2)
    return w1, b1, w2, b2


if __name__ == "__main__":
    # Small shapes consistent with the module's forward: (b, 3, H, W).
    batch, hh, ww = 2, 16, 16
    hidden_dim, num_classes = 128, 6
    input_dim = 3 * hh * ww

    key = jax.random.PRNGKey(0)
    kx, kp = jax.random.split(key)
    x = jax.random.normal(kx, (batch, 3, hh, ww), dtype=jnp.float32)
    w1, b1, w2, b2 = init_params(kp, input_dim, hidden_dim, num_classes)

    # Reference reproducing the kernel's numerics: bf16 MXU operands, f32 accumulation.
    x_bf = x.reshape(batch, -1).astype(jnp.bfloat16).astype(jnp.float32)
    w1_bf = w1.astype(jnp.bfloat16).astype(jnp.float32)
    w2_bf = w2.astype(jnp.bfloat16).astype(jnp.float32)
    h_ref = jnp.maximum(
        jnp.dot(x_bf, w1_bf, precision=jax.lax.Precision.HIGHEST) + b1[None, :], 0.0)
    ref = jnp.dot(h_ref.astype(jnp.bfloat16).astype(jnp.float32), w2_bf,
                  precision=jax.lax.Precision.HIGHEST) + b2[None, :]

    # 1) Default path: w1 fully VMEM-resident, single-pass kernel.
    logits = mlp_classifier_forward(x, w1, b1, w2, b2)
    jax.block_until_ready(logits)
    assert logits.shape == (batch, num_classes)
    assert jnp.allclose(logits, ref, atol=1e-3, rtol=1e-3), (
        f"resident path: max err {jnp.max(jnp.abs(logits - ref))}")

    # 2) Forced K-tiled path (exercises the accumulator kernel used when w1 > VMEM budget).
    logits_kt = mlp_classifier_forward(x, w1, b1, w2, b2, tk_max=256)
    jax.block_until_ready(logits_kt)
    assert logits_kt.shape == (batch, num_classes)
    assert jnp.allclose(logits_kt, ref, atol=1e-3, rtol=1e-3), (
        f"k-tiled path: max err {jnp.max(jnp.abs(logits_kt - ref))}")

    print("KERNEL_OK")
</pallas_src>

<mosaic_0001>
module attributes {stable_mosaic.version = 11 : i64} {
  func.func @mlp_kernel_resident(%arg0: i32, %arg1: memref<16x768xbf16, #tpu.memory_space<vmem>>, %arg2: memref<768x128xbf16, #tpu.memory_space<vmem>>, %arg3: memref<1x128xf32, #tpu.memory_space<vmem>>, %arg4: memref<128x128xbf16, #tpu.memory_space<vmem>>, %arg5: memref<1x128xf32, #tpu.memory_space<vmem>>, %arg6: memref<16x128xf32, #tpu.memory_space<vmem>>) attributes {dimension_semantics = [#tpu.dimension_semantics<parallel>], iteration_bounds = array<i64: 1>, scalar_prefetch = 0 : i64, scratch_operands = 0 : i64, tpu.core_type = #tpu.core_type<tc>, window_params = [{transform_indices = @transform_0, window_bounds = array<i64: 16, 768>}, {pipeline_mode = #tpu.pipeline_mode<synchronous>, transform_indices = @transform_1, window_bounds = array<i64: 768, 128>}, {pipeline_mode = #tpu.pipeline_mode<synchronous>, transform_indices = @transform_2, window_bounds = array<i64: 1, 128>}, {pipeline_mode = #tpu.pipeline_mode<synchronous>, transform_indices = @transform_3, window_bounds = array<i64: 128, 128>}, {pipeline_mode = #tpu.pipeline_mode<synchronous>, transform_indices = @transform_4, window_bounds = array<i64: 1, 128>}, {transform_indices = @transform_5, window_bounds = array<i64: 16, 128>}]} {
    %c0 = arith.constant 0 : index
    %c0_0 = arith.constant 0 : index
    %0 = vector.load %arg1[%c0, %c0_0] : memref<16x768xbf16, #tpu.memory_space<vmem>>, vector<16x768xbf16>
    %c0_1 = arith.constant 0 : index
    %c0_2 = arith.constant 0 : index
    %1 = vector.load %arg2[%c0_1, %c0_2] : memref<768x128xbf16, #tpu.memory_space<vmem>>, vector<768x128xbf16>
    %cst = arith.constant dense<0.000000e+00> : vector<16x128xf32>
    %2 = tpu.matmul %0, %1, %cst {dimension_numbers = #tpu.dot_dimension_numbers<[1], [0], [0], [1], [0, 0, 1, 1], [], []>} : vector<16x768xbf16>, vector<768x128xbf16>, vector<16x128xf32> -> vector<16x128xf32>
    %c0_3 = arith.constant 0 : index
    %c0_4 = arith.constant 0 : index
    %3 = vector.load %arg3[%c0_3, %c0_4] : memref<1x128xf32, #tpu.memory_space<vmem>>, vector<1x128xf32>
    %4 = vector.broadcast %3 : vector<1x128xf32> to vector<16x128xf32>
    %5 = arith.addf %2, %4 : vector<16x128xf32>
    %cst_5 = arith.constant 0.000000e+00 : f32
    %6 = vector.broadcast %cst_5 : f32 to vector<16x128xf32>
    %7 = arith.maximumf %5, %6 : vector<16x128xf32>
    %8 = arith.truncf %7 : vector<16x128xf32> to vector<16x128xbf16>
    %c0_6 = arith.constant 0 : index
    %c0_7 = arith.constant 0 : index
    %9 = vector.load %arg4[%c0_6, %c0_7] : memref<128x128xbf16, #tpu.memory_space<vmem>>, vector<128x128xbf16>
    %cst_8 = arith.constant dense<0.000000e+00> : vector<16x128xf32>
    %10 = tpu.matmul %8, %9, %cst_8 {dimension_numbers = #tpu.dot_dimension_numbers<[1], [0], [0], [1], [0, 0, 1, 1], [], []>} : vector<16x128xbf16>, vector<128x128xbf16>, vector<16x128xf32> -> vector<16x128xf32>
    %c0_9 = arith.constant 0 : index
    %c0_10 = arith.constant 0 : index
    %11 = vector.load %arg5[%c0_9, %c0_10] : memref<1x128xf32, #tpu.memory_space<vmem>>, vector<1x128xf32>
    %12 = vector.broadcast %11 : vector<1x128xf32> to vector<16x128xf32>
    %13 = arith.addf %10, %12 : vector<16x128xf32>
    %c0_11 = arith.constant 0 : index
    %c0_12 = arith.constant 0 : index
    %14 = vector.load %arg6[%c0_11, %c0_12] : memref<16x128xf32, #tpu.memory_space<vmem>>, vector<16x128xf32>
    tpu.vector_store %arg6[%c0_11, %c0_12], %13 {strides = array<i32>} : memref<16x128xf32, #tpu.memory_space<vmem>>, vector<16x128xf32>,
    return
  }
  func.func @transform_0(%arg0: i32) -> (i32, i32) {
    %c0_i32 = arith.constant 0 : i32
    %c0_i32_0 = arith.constant 0 : i32
    return %arg0, %c0_i32 : i32, i32
  }
  func.func @transform_1(%arg0: i32) -> (i32, i32) {
    %c0_i32 = arith.constant 0 : i32
    %c0_i32_0 = arith.constant 0 : i32
    %c0_i32_1 = arith.constant 0 : i32
    return %c0_i32, %c0_i32_0 : i32, i32
  }
  func.func @transform_2(%arg0: i32) -> (i32, i32) {
    %c0_i32 = arith.constant 0 : i32
    %c0_i32_0 = arith.constant 0 : i32
    %c0_i32_1 = arith.constant 0 : i32
    return %c0_i32, %c0_i32_0 : i32, i32
  }
  func.func @transform_3(%arg0: i32) -> (i32, i32) {
    %c0_i32 = arith.constant 0 : i32
    %c0_i32_0 = arith.constant 0 : i32
    %c0_i32_1 = arith.constant 0 : i32
    return %c0_i32, %c0_i32_0 : i32, i32
  }
  func.func @transform_4(%arg0: i32) -> (i32, i32) {
    %c0_i32 = arith.constant 0 : i32
    %c0_i32_0 = arith.constant 0 : i32
    %c0_i32_1 = arith.constant 0 : i32
    return %c0_i32, %c0_i32_0 : i32, i32
  }
  func.func @transform_5(%arg0: i32) -> (i32, i32) {
    %c0_i32 = arith.constant 0 : i32
    %c0_i32_0 = arith.constant 0 : i32
    return %arg0, %c0_i32 : i32, i32
  }
}

</mosaic_0001>

<bundles_post_ra>
// kernel: tpu_custom_call.1
= control target key start
LH: loop header
LB: loop body
LE: loop exit
PB: predicated region body
PF: predicated region fallthrough
CT: control target
= control target key end

     0   :  { %10 = vsyncpa [#allocation3], 0  ;;  %s1130_s0 = inlined_call_operand.hbm [shape: bf16[16,768], index: 0, kind: input, shape index: {}]   ;;  %s1131_s1 = inlined_call_operand.hbm [shape: bf16[768,128], index: 1, kind: input, shape index: {}]   ;;  %s1132_s2 = inlined_call_operand.vmem [shape: f32[1,128], index: 2, kind: input, shape index: {}]   ;;  %s1133_s3 = inlined_call_operand.hbm [shape: bf16[128,128], index: 3, kind: input, shape index: {}]   ;;  %s1134_s4 = inlined_call_operand.vmem [shape: f32[1,128], index: 4, kind: input, shape index: {}]   ;;  %s1135_s5 = inlined_call_operand.hbm [shape: f32[16,128], index: 5, kind: output, shape index: {}]  }
   0x1   :  { %11 = vsyncpa [#allocation6], 0 }
   0x2   :  { %12 = vsyncpa [#allocation4], 0  ;;  %s1070_s18 = smov [#allocation5]  }
   0x3   :  { %s30_s19 = sshll.u32 %s1070_s18, 4  ;;  %s31_s19 = int_to_ptr.vmem [resolvable:$true] %s30_s19 }
   0x4   :  { %s992_s20 = scalar_lea.vmem %s31_s19, 6144  ;;  %p997_p1 = scmp.lt.s32.totalorder %s31_s19, %s31_s19 }
   0x5   :  { %p993_p0 = scmp.ne.s32.totalorder %s31_s19, %s992_s20  ;;  %p998_p2 = scmp.lt.s32.totalorder %s992_s20, %s992_s20 }
   0x7   :  { %p999_p3 = por %p998_p2, %p997_p1 }
   0x9   :  { %p1000_p4 = pnand %p999_p3, %p993_p0 }
   0xb   :  { %1003 = shalt.err (!%p1000_p4)
}
   0xc   :  { %s1071_s21 = smov 64   ;;  %s1072_s22 = smov 4  }
   0xd   :  { %36 = dma.hbm_to_vmem [thread:$0]  %s1131_s1, 6144, %s31_s19, [#allocation6], %s1071_s21, %s1071_s21, %s1072_s22  }
   0xe   :  { %s1073_s25 = smov [#allocation2]  }
   0xf   :  { %s18_s26 = sshll.u32 %s1073_s25, 4  ;;  %s19_s26 = int_to_ptr.vmem [resolvable:$true] %s18_s26 }
  0x10   :  { %s1012_s27 = scalar_lea.vmem %s19_s26, 768  ;;  %p1017_p6 = scmp.lt.s32.totalorder %s19_s26, %s19_s26 }
  0x11   :  { %p1013_p5 = scmp.ne.s32.totalorder %s19_s26, %s1012_s27  ;;  %p1018_p7 = scmp.lt.s32.totalorder %s1012_s27, %s1012_s27 }
  0x13   :  { %p1019_p8 = por %p1018_p7, %p1017_p6 }
  0x15   :  { %p1020_p9 = pnand %p1019_p8, %p1013_p5 }
  0x17   :  { %1023 = shalt.err (!%p1020_p9)
}
  0x18   :  { %s1074_s28 = smov 384   ;;  %s1075_s29 = smov 24  }
  0x19   :  { %24 = dma.hbm_to_vmem [thread:$0]  %s1130_s0, 768, %s19_s26, [#allocation3], %s1074_s28, %s1074_s28, %s1075_s29  }
  0x1a   :  { %s1076_s7 = smov [#allocation7]  }
  0x1b   :  { %s44_s8 = sshll.u32 %s1076_s7, 4  ;;  %s45_s8 = int_to_ptr.vmem [resolvable:$true] %s44_s8 }
  0x1c   :  { %s1032_s1 = scalar_lea.vmem %s45_s8, 1024  ;;  %p1037_p11 = scmp.lt.s32.totalorder %s45_s8, %s45_s8 }
  0x1d   :  { %p1033_p10 = scmp.ne.s32.totalorder %s45_s8, %s1032_s1  ;;  %p1038_p12 = scmp.lt.s32.totalorder %s1032_s1, %s1032_s1 }
  0x1f   :  { %p1039_p13 = por %p1038_p12, %p1037_p11 }
  0x21   :  { %p1040_p0 = pnand %p1039_p13, %p1033_p10 }
  0x23   :  { %1043 = shalt.err (!%p1040_p0)
}
  0x24   :  { %50 = dma.hbm_to_vmem [thread:$0]  %s1133_s3, 1024, %s45_s8, [#allocation6], %s1071_s21, %s1071_s21, %s1072_s22  }
  0x25   :  { %1064 = dma.done.wait [#allocation3], 768  }
  0x26   :  { %1065 = vsyncadd [#allocation3], 4294966528 }
  0x27   :  { %1066 = dma.done.wait [#allocation6], 7168  }
  0x28   :  { %1067 = vsyncadd [#allocation6], 4294960128  ;;  %v919_v0 = vld [vmem:[#allocation5 + $0x78] sm:$0xff]   ;;  %v923_v4 = vld [vmem:[#allocation5 + $0x70] sm:$0xff]   ;;  %v1077_v55 = vmov 0.0   ;;  %vm1078_vm0 = vmmov 0  }
  0x29   :  { %v920_v1 = vld [vmem:[#allocation5 + $0x38] sm:$0xff]   ;;  %812 = vmatprep.subr.bf16.mxu0 %v919_v0  ;;  %v924_v5 = vld [vmem:[#allocation5 + $0x30] sm:$0xff]   ;;  %v927_v8 = vld [vmem:[#allocation5 + $0x68] sm:$0xff]   ;;  %s1079_s12 = smov [#allocation8]  }
  0x2a   :  { %v921_v2 = vld [vmem:[#allocation5 + $0xf8] sm:$0xff]   ;;  %813 = vmatpush3.bf16.msra.mxu0 %v920_v1  ;;  %v925_v6 = vld [vmem:[#allocation5 + $0xf0] sm:$0xff]   ;;  %v928_v9 = vld [vmem:[#allocation5 + $0x28] sm:$0xff]   ;;  %s735_s13 = sshll.u32 %s1079_s12, 4  ;;  %s736_s13 = int_to_ptr.vmem [resolvable:$true] %s735_s13 }
  0x2b   :  { %v922_v3 = vld [vmem:[#allocation5 + $0xb8] sm:$0xff]   ;;  %834 = vmatprep.subr.bf16.mxu1 %v921_v2  ;;  %814 = vmatprep.subr.bf16.mxu0 %v923_v4  ;;  %v926_v7 = vld [vmem:[#allocation5 + $0xb0] sm:$0xff]   ;;  %v929_v10 = vld [vmem:[#allocation5 + $0xe8] sm:$0xff]   ;;  %s1044_s14 = scalar_lea.vmem %s736_s13, 256  ;;  %p1049_p2 = scmp.lt.s32.totalorder %s736_s13, %s736_s13 }
  0x2c   :  { %835 = vmatpush3.bf16.msra.mxu1 %v922_v3  ;;  %v930_v11 = vld [vmem:[#allocation5 + $0xa8] sm:$0xff]   ;;  %v931_v12 = vld [vmem:[#allocation5 + $0x60] sm:$0xff]   ;;  %v935_v16 = vld [vmem:[#allocation5 + $0x58] sm:$0xff]   ;;  %p1045_p1 = scmp.ne.s32.totalorder %s736_s13, %s1044_s14  ;;  %p1050_p3 = scmp.lt.s32.totalorder %s1044_s14, %s1044_s14 }
  0x2d   :  { %836 = vmatprep.subr.bf16.mxu1 %v925_v6  ;;  %v932_v13 = vld [vmem:[#allocation5 + $0x20] sm:$0xff]   ;;  %v936_v17 = vld [vmem:[#allocation5 + $0x18] sm:$0xff]   ;;  %v939_v20 = vld [vmem:[#allocation5 + $0x50] sm:$0xff]  }
  0x2e   :  { %815 = vmatpush3.bf16.msra.mxu0 %v924_v5  ;;  %v933_v14 = vld [vmem:[#allocation5 + $0xe0] sm:$0xff]   ;;  %v937_v18 = vld [vmem:[#allocation5 + $0xd8] sm:$0xff]   ;;  %v940_v21 = vld [vmem:[#allocation5 + $0x10] sm:$0xff]   ;;  %p1051_p4 = por %p1050_p3, %p1049_p2 }
  0x2f   :  { %816 = vmatprep.subr.bf16.mxu0 %v927_v8  ;;  %v934_v15 = vld [vmem:[#allocation5 + $0xa0] sm:$0xff]   ;;  %v938_v19 = vld [vmem:[#allocation5 + $0x98] sm:$0xff]   ;;  %v941_v22 = vld [vmem:[#allocation5 + $0xd0] sm:$0xff]  }
  0x30   :  { %837 = vmatpush3.bf16.msra.mxu1 %v926_v7  ;;  %v942_v23 = vld [vmem:[#allocation5 + $0x90] sm:$0xff]   ;;  %v943_v24 = vld [vmem:[#allocation5 + $0x48] sm:$0xff]   ;;  %v947_v28 = vld [vmem:[#allocation5 + $0x40] sm:$0xff]   ;;  %p1052_p5 = pnand %p1051_p4, %p1045_p1 }
  0x31   :  { %838 = vmatprep.subr.bf16.mxu1 %v929_v10  ;;  %v944_v25 = vld [vmem:[#allocation5 + $0x8] sm:$0xff]   ;;  %v948_v29 = vld [vmem:[#allocation5] sm:$0xff]   ;;  %v954_v34 = vld [vmem:[#allocation5 + $0x178] sm:$0xff]  }
  0x32   :  { %817 = vmatpush3.bf16.msra.mxu0 %v928_v9  ;;  %v945_v26 = vld [vmem:[#allocation5 + $0xc8] sm:$0xff]   ;;  %v949_v30 = vld [vmem:[#allocation5 + $0xc0] sm:$0xff]   ;;  %v955_v35 = vld [vmem:[#allocation2 + $0x8] ss:$24 sps:$4 sm:$0xff]  }
  0x33   :  { %818 = vmatprep.subr.bf16.mxu0 %v931_v12  ;;  %v946_v27 = vld [vmem:[#allocation5 + $0x88] sm:$0xff]   ;;  %v953_v33 = vld [vmem:[#allocation5 + $0x80] sm:$0xff]   ;;  %v957_v36 = vld [vmem:[#allocation2 + $0xc] ss:$24 sps:$4 sm:$0xff]  }
  0x34   :  { %839 = vmatpush3.bf16.msra.mxu1 %v930_v11  ;;  %v950_v31 = vld [vmem:[#allocation2] ss:$24 sps:$4 sm:$0xff]   ;;  %v952_v32 = vld [vmem:[#allocation2 + $0x4] ss:$24 sps:$4 sm:$0xff]   ;;  %v958_v37 = vld [vmem:[#allocation5 + $0x138] sm:$0xff]   ;;  %563 = vmatprep.mubr.bf16.mxu1 %v957_v36 }
  0x35   :  { %840 = vmatprep.subr.bf16.mxu1 %v933_v14  ;;  %522 = vmatprep.mubr.bf16.mxu0 %v952_v32  ;;  %v959_v38 = vld [vmem:[#allocation5 + $0x170] sm:$0xff]   ;;  %v961_v40 = vld [vmem:[#allocation5 + $0x168] sm:$0xff]   ;;  %v963_v42 = vld [vmem:[#allocation5 + $0x160] sm:$0xff]  }
  0x36   :  { %819 = vmatpush3.bf16.msra.mxu0 %v932_v13  ;;  %v960_v39 = vld [vmem:[#allocation5 + $0x130] sm:$0xff]   ;;  %v962_v41 = vld [vmem:[#allocation5 + $0x128] sm:$0xff]   ;;  %v964_v43 = vld [vmem:[#allocation5 + $0x120] sm:$0xff]  }
  0x37   :  { %820 = vmatprep.subr.bf16.mxu0 %v935_v16  ;;  %v965_v44 = vld [vmem:[#allocation5 + $0x158] sm:$0xff]   ;;  %v967_v46 = vld [vmem:[#allocation5 + $0x150] sm:$0xff]   ;;  %v969_v49 = vld [vmem:[#allocation5 + $0x148] sm:$0xff]  }
  0x38   :  { %841 = vmatpush3.bf16.msra.mxu1 %v934_v15  ;;  %v966_v45 = vld [vmem:[#allocation5 + $0x118] sm:$0xff]   ;;  %v968_v48 = vld [vmem:[#allocation5 + $0x110] sm:$0xff]   ;;  %v970_v50 = vld [vmem:[#allocation5 + $0x108] sm:$0xff]  }
  0x39   :  { %842 = vmatprep.subr.bf16.mxu1 %v937_v18  ;;  %v975_v47 = vld [vmem:[#allocation2 + $0x14] ss:$24 sps:$4 sm:$0xff]   ;;  %v973_v53 = vld [vmem:[#allocation2 + $0x10] ss:$24 sps:$4 sm:$0xff]   ;;  %v977_v56 = vld [vmem:[#allocation7 + $0x30] sm:$0xff]  }
  0x3a   :  { %821 = vmatpush3.bf16.msra.mxu0 %v936_v17  ;;  %v971_v51 = vld [vmem:[#allocation5 + $0x140] sm:$0xff]   ;;  %v976_v54 = vld [vmem:[#allocation7 + $0x38] sm:$0xff]   ;;  %v978_v57 = vld [vmem:[#allocation7 + $0x28] sm:$0xff]  }
  0x3b   :  { %822 = vmatprep.subr.bf16.mxu0 %v939_v20  ;;  %v972_v52 = vld [vmem:[#allocation5 + $0x100] sm:$0xff]   ;;  %v980_v59 = vld [vmem:[#allocation7 + $0x18] sm:$0xff]   ;;  %v981_v60 = vld [vmem:[#allocation7 + $0x10] sm:$0xff]  }
  0x3c   :  { %843 = vmatpush3.bf16.msra.mxu1 %v938_v19  ;;  %v979_v58 = vld [vmem:[#allocation7 + $0x20] sm:$0xff]   ;;  %v982_v61 = vld [vmem:[#allocation7 + $0x8] sm:$0xff]   ;;  %v748_v7 = vld [vmem:[%s1132_s2] ss:$0 sm:$0xff] }
  0x3d   :  { %844 = vmatprep.subr.bf16.mxu1 %v941_v22  ;;  %v983_v62 = vld [vmem:[#allocation7] sm:$0xff]  }
  0x3e   :  { %823 = vmatpush3.bf16.msra.mxu0 %v940_v21 }
  0x3f   :  { %824 = vmatprep.subr.bf16.mxu0 %v943_v24 }
  0x40   :  { %845 = vmatpush3.bf16.msra.mxu1 %v942_v23 }
  0x41   :  { %846 = vmatprep.subr.bf16.mxu1 %v945_v26 }
  0x42   :  { %825 = vmatpush3.bf16.msra.mxu0 %v944_v25 }
  0x43   :  { %826 = vmatprep.subr.bf16.mxu0 %v947_v28 }
  0x44   :  { %847 = vmatpush3.bf16.msra.mxu1 %v946_v27  ;;  %v803_v27 = vld [vmem:[%s1134_s4] ss:$0 sm:$0xff] }
  0x45   :  { %848 = vmatprep.subr.bf16.mxu1 %v949_v30 }
  0x46   :  { %827 = vmatpush3.bf16.msra.mxu0 %v948_v29 }
  0x47   :  { %856 = vmatprep.subr.bf16.mxu0 %v954_v34 }
  0x48   :  { %849 = vmatpush3.bf16.msra.mxu1 %v953_v33 }
  0x49   :  { %523 = vmatmul.mubr.bf16.vlgmr.msra.gmra.mxu0 %v950_v31  ;;  %887 = vmatprep.subr.bf16.mxu1 %v1077_v55 }
  0x4a   :  { %857 = vmatpush3.bf16.msra.mxu0 %v958_v37  ;;  %604 = vmatprep.mubr.bf16.mxu0 %v975_v47 }
  0x4b   :  { %564 = vmatmul.mubr.bf16.vlgmr.msra.gmra.mxu1 %v955_v35  ;;  %858 = vmatprep.subr.bf16.mxu0 %v959_v38 }
  0x4c   :  { %888 = vmatpush3.bf16.msra.mxu1 %v976_v54  ;;  %903 = vmatprep.mubr.msk.bf16.mxu1 %vm1078_vm0, %v1077_v55 }
  0x4d   :  { %889 = vmatprep.subr.bf16.mxu1 %v1077_v55 }
  0x4e   :  { %859 = vmatpush3.bf16.msra.mxu0 %v960_v39 }
  0x4f   :  { %860 = vmatprep.subr.bf16.mxu0 %v961_v40 }
  0x50   :  { %890 = vmatpush3.bf16.msra.mxu1 %v977_v56 }
  0x51   :  { %891 = vmatprep.subr.bf16.mxu1 %v1077_v55 }
  0x52   :  { %861 = vmatpush3.bf16.msra.mxu0 %v962_v41 }
  0x53   :  { %862 = vmatprep.subr.bf16.mxu0 %v963_v42 }
  0x54   :  { %892 = vmatpush3.bf16.msra.mxu1 %v978_v57 }
  0x55   :  { %893 = vmatprep.subr.bf16.mxu1 %v1077_v55 }
  0x56   :  { %863 = vmatpush3.bf16.msra.mxu0 %v964_v43 }
  0x57   :  { %864 = vmatprep.subr.bf16.mxu0 %v965_v44 }
  0x58   :  { %894 = vmatpush3.bf16.msra.mxu1 %v979_v58 }
  0x59   :  { %895 = vmatprep.subr.bf16.mxu1 %v1077_v55 }
  0x5a   :  { %865 = vmatpush3.bf16.msra.mxu0 %v966_v45 }
  0x5b   :  { %866 = vmatprep.subr.bf16.mxu0 %v967_v46 }
  0x5c   :  { %896 = vmatpush3.bf16.msra.mxu1 %v980_v59 }
  0x5d   :  { %897 = vmatprep.subr.bf16.mxu1 %v1077_v55 }
  0x5e   :  { %867 = vmatpush3.bf16.msra.mxu0 %v968_v48 }
  0x5f   :  { %868 = vmatprep.subr.bf16.mxu0 %v969_v49 }
  0x60   :  { %898 = vmatpush3.bf16.msra.mxu1 %v981_v60 }
  0x61   :  { %899 = vmatprep.subr.bf16.mxu1 %v1077_v55 }
  0x62   :  { %869 = vmatpush3.bf16.msra.mxu0 %v970_v50 }
  0x63   :  { %870 = vmatprep.subr.bf16.mxu0 %v971_v51 }
  0x64   :  { %900 = vmatpush3.bf16.msra.mxu1 %v982_v61 }
  0x65   :  { %901 = vmatprep.subr.bf16.mxu1 %v1077_v55 }
  0x66   :  { %871 = vmatpush3.bf16.msra.mxu0 %v972_v52 }
  0x68   :  { %902 = vmatpush3.bf16.msra.mxu1 %v983_v62 }
  0x69   :  { %605 = vmatmul.mubr.bf16.vlgmr.msra.gmra.mxu0 %v973_v53 }
 0x109   :  { %v828_v63 = vpop.f32.mrf.mxu0 }
 0x10b   :  { %v829_v0 = vpop.f32.mrf.mxu0  ;;  %v850_v1 = vpop.f32.mrf.mxu1 }
 0x10c   :  { %v830_v6 = vadd.f32 %v829_v0, %v828_v63 }
 0x10d   :  { %v831_v2 = vpop.f32.mrf.mxu0  ;;  %v851_v3 = vpop.f32.mrf.mxu1 }
 0x10e   :  { %v525_v11 = vadd.f32 %v830_v6, %v748_v7  ;;  %v852_v12 = vadd.f32 %v851_v3, %v850_v1 }
 0x10f   :  { %v832_v4 = vpop.f32.mrf.mxu0  ;;  %v853_v5 = vpop.f32.mrf.mxu1 }
 0x110   :  { %v833_v8 = vadd.f32 %v832_v4, %v831_v2  ;;  %v566_v18 = vadd.f32 %v852_v12, %v525_v11 }
 0x111   :  { %v854_v9 = vpop.f32.mrf.mxu1 }
 0x112   :  { %v528_v14 = vadd.f32 %v833_v8, %v748_v7  ;;  %v855_v15 = vadd.f32 %v854_v9, %v853_v5 }
 0x114   :  { %v569_v20 = vadd.f32 %v855_v15, %v528_v14 }
 0x129   :  { %v872_v10 = vpop.f32.mrf.mxu0 }
 0x12b   :  { %v873_v13 = vpop.f32.mrf.mxu0 }
 0x12c   :  { %v874_v16 = vadd.f32 %v873_v13, %v872_v10 }
 0x12d   :  { %v875_v17 = vpop.f32.mrf.mxu0 }
 0x12e   :  { %v607_v21 = vadd.f32 %v874_v16, %v566_v18 }
 0x12f   :  { %v876_v19 = vpop.f32.mrf.mxu0 }
 0x130   :  { %v877_v22 = vadd.f32 %v876_v19, %v875_v17  ;;  %v613_v24 = vmax.f32 %v607_v21, 0.0 }
 0x132   :  { %v610_v23 = vadd.f32 %v877_v22, %v569_v20 }
 0x134   :  { %v614_v25 = vmax.f32 %v610_v23, 0.0 }
 0x136   :  { %v615_v26 = vpack.c.bf16 %v614_v25, %v613_v24 }
 0x138   :  { %904 = vmatmul.mubr.bf16.vlgmr.msra.gmra.mxu1 %v615_v26 }
 0x1f8   :  { %v721_v28 = vpop.f32.mrf.mxu1 }
 0x1f9   :  { %v722_v29 = vadd.f32 %v803_v27, %v721_v28 }
 0x1fa   :  { %v905_v30 = vpop.f32.mrf.mxu1 }
 0x1fb   :  { %728 = vst [vmem:[#allocation8] sm:$0xff] %v722_v29 }
 0x1fc   :  { %v724_v31 = vpop.f32.mrf.mxu1 }
 0x1fd   :  { %v725_v32 = vadd.f32 %v803_v27, %v724_v31 }
 0x1fe   :  { %v906_v33 = vpop.f32.mrf.mxu1 }
 0x1ff   :  { %729 = vst [vmem:[#allocation8 + $0x8] sm:$0xff] %v725_v32 }
 0x200   :  { %1055 = shalt.err (!%p1052_p5)
}
 0x201   :  { %s1080_s15 = smov 128   ;;  %s1081_s4 = smov 8  }
 0x202   :  { %741 = dma.vmem_to_hbm [thread:$0]  %s736_s13, 256, %s1135_s5, [#allocation4], %s1080_s15, %s1080_s15, %s1081_s4  }
 0x203   :  { %1068 = dma.done.wait [#allocation4], 256  }
 0x204   :  { %1069 = vsyncadd [#allocation4], 4294967040 }
 0x205   :  { %745 = vsyncpa [#allocation3], 1 }
 0x206   :  { %746 = vsyncpa [#allocation6], 1 }
 0x207   :  { %747 = vsyncpa [#allocation4], 1 }

</bundles_post_ra>
